<compile_context>
chip_gen: v7x
topology: tpu7x:2x2x1
jax: 0.10.0
libtpu: 0.0.40
codegen_flags: <defaults>
</compile_context>

<pallas_src>
import functools
import math

import jax
import jax.numpy as jnp
from jax import lax
from jax.experimental import pallas as pl
from jax.experimental.pallas import tpu as pltpu


# Contract last dim of x (TM, K) with last dim of w (TN, K) -> (TM, TN).
_DN = (((1,), (1,)), ((), ()))


def _lr_kernel_fullk(x1_ref, x2_ref, w1_ref, w2_ref, b_ref, o_ref):
    # x*_ref: (TM, K)   w*_ref: (TN, K)   b_ref: (1, TN)   o_ref: (TM, TN)
    z = lax.dot_general(x1_ref[...], w1_ref[...], _DN,
                        preferred_element_type=jnp.float32)
    z = z + lax.dot_general(x2_ref[...], w2_ref[...], _DN,
                            preferred_element_type=jnp.float32)
    z = z + b_ref[...]
    o_ref[...] = (1.0 / (1.0 + jnp.exp(-z))).astype(o_ref.dtype)


def _lr_kernel_splitk(x1_ref, x2_ref, w1_ref, w2_ref, b_ref, o_ref, acc_ref):
    # Same as above but with a K grid axis and an f32 VMEM accumulator.
    k = pl.program_id(2)

    @pl.when(k == 0)
    def _init():
        acc_ref[...] = jnp.zeros_like(acc_ref)

    acc_ref[...] += (
        lax.dot_general(x1_ref[...], w1_ref[...], _DN,
                        preferred_element_type=jnp.float32)
        + lax.dot_general(x2_ref[...], w2_ref[...], _DN,
                          preferred_element_type=jnp.float32)
    )

    @pl.when(k == pl.num_programs(2) - 1)
    def _finalize():
        z = acc_ref[...] + b_ref[...]
        o_ref[...] = (1.0 / (1.0 + jnp.exp(-z))).astype(o_ref.dtype)


def _round_up(x, m):
    return -(-x // m) * m


def _tile_and_pad(dim, target, align):
    """Return (tile, padded_dim): tile is align-multiple, <= max(target, align),
    and divides padded_dim (>= dim)."""
    padded = _round_up(dim, align)
    target = max((target // align) * align, align)
    if padded <= target:
        return padded, padded
    t = target
    while t >= align:
        if padded % t == 0:
            return t, padded
        t -= align
    return target, _round_up(padded, target)


def _pad2d(a, rows, cols):
    pr, pc = rows - a.shape[0], cols - a.shape[1]
    if pr or pc:
        a = jnp.pad(a, ((0, pr), (0, pc)))
    return a


def _vmem_limit_bytes():
    # ~75% of physical VMEM, capped at 96 MiB (=> ~48 MiB on v7x, 96 MiB on
    # v5e/v6e). Falls back to a safe constant if no TPU info is available.
    try:
        cap = int(pltpu.get_tpu_info().vmem_capacity_bytes)
    except Exception:
        cap = 128 * 1024 * 1024
    return min(cap * 3 // 4, 96 * 1024 * 1024)


@functools.partial(
    jax.jit,
    static_argnames=("tile_m", "tile_n", "tile_k", "use_bf16_mxu", "max_fullk"))
def lr_forward(x1, x2, weight, bias, *, tile_m=256, tile_n=256, tile_k=512,
               use_bf16_mxu=False, max_fullk=2048):
    """sigmoid(cat(x1, x2).reshape(B, -1) @ weight.T + bias).

    x1, x2 : (B, T, F) float32
    weight : (C, 2*T*F) float32   (PyTorch nn.Linear convention)
    bias   : (C,)       float32
    returns: (B, C)     float32
    """
    B, T, F = x1.shape
    K = T * F
    C = weight.shape[0]
    assert weight.shape == (C, 2 * K)
    assert bias.shape == (C,)

    in_dtype = jnp.bfloat16 if use_bf16_mxu else jnp.float32
    m_align = 16 if use_bf16_mxu else 8

    # Flatten the two team halves; split the weight once into the x1 / x2
    # column blocks (matches cat(x1, x2).view(B, -1) column order).
    x1f = x1.reshape(B, K)
    x2f = x2.reshape(B, K)
    w1 = weight[:, :K]
    w2 = weight[:, K:]

    # Tile sizes + alignment padding (lane-dense output, predictable tiling).
    TM, B_pad = _tile_and_pad(B, tile_m, m_align)
    TN, C_pad = _tile_and_pad(C, tile_n, 128)
    if K <= max_fullk:
        K_pad = _round_up(K, 128)
        TK, n_k = K_pad, 1
    else:
        TK, K_pad = _tile_and_pad(K, tile_k, 128)
        n_k = K_pad // TK

    # v7x megacore: make sure at least one "parallel" axis has >= 2 blocks.
    if (B_pad // TM == 1 and C_pad // TN == 1
            and TM // 2 >= m_align and (TM // 2) % m_align == 0):
        TM //= 2

    x1f = _pad2d(x1f, B_pad, K_pad).astype(in_dtype)
    x2f = _pad2d(x2f, B_pad, K_pad).astype(in_dtype)
    w1 = _pad2d(w1, C_pad, K_pad).astype(in_dtype)
    w2 = _pad2d(w2, C_pad, K_pad).astype(in_dtype)
    b2 = _pad2d(bias.reshape(1, C).astype(jnp.float32), 1, C_pad)

    in_bytes = 2 if use_bf16_mxu else 4
    cost = pl.CostEstimate(
        flops=2 * B_pad * C_pad * 2 * K_pad,
        transcendentals=B_pad * C_pad,
        bytes_accessed=in_bytes * (2 * B_pad * K_pad + 2 * C_pad * K_pad)
        + 4 * (B_pad * C_pad + C_pad),
    )
    compiler_params = pltpu.CompilerParams(
        dimension_semantics=("parallel", "parallel")
        + (("arbitrary",) if n_k > 1 else ()),
        vmem_limit_bytes=_vmem_limit_bytes(),
    )

    if n_k == 1:
        grid = (B_pad // TM, C_pad // TN)
        grid_spec = pltpu.PrefetchScalarGridSpec(
            num_scalar_prefetch=0,
            grid=grid,
            in_specs=[
                pl.BlockSpec((TM, K_pad), lambda i, j: (i, 0)),   # x1 half
                pl.BlockSpec((TM, K_pad), lambda i, j: (i, 0)),   # x2 half
                pl.BlockSpec((TN, K_pad), lambda i, j: (j, 0)),   # w1 half
                pl.BlockSpec((TN, K_pad), lambda i, j: (j, 0)),   # w2 half
                pl.BlockSpec((1, TN), lambda i, j: (0, j)),       # bias
            ],
            out_specs=pl.BlockSpec((TM, TN), lambda i, j: (i, j)),
        )
        kernel = _lr_kernel_fullk
    else:
        grid = (B_pad // TM, C_pad // TN, n_k)
        grid_spec = pltpu.PrefetchScalarGridSpec(
            num_scalar_prefetch=0,
            grid=grid,
            in_specs=[
                pl.BlockSpec((TM, TK), lambda i, j, k: (i, k)),
                pl.BlockSpec((TM, TK), lambda i, j, k: (i, k)),
                pl.BlockSpec((TN, TK), lambda i, j, k: (j, k)),
                pl.BlockSpec((TN, TK), lambda i, j, k: (j, k)),
                pl.BlockSpec((1, TN), lambda i, j, k: (0, j)),
            ],
            out_specs=pl.BlockSpec((TM, TN), lambda i, j, k: (i, j)),
            scratch_shapes=[pltpu.VMEM((TM, TN), jnp.float32)],
        )
        kernel = _lr_kernel_splitk

    out = pl.pallas_call(
        kernel,
        out_shape=jax.ShapeDtypeStruct((B_pad, C_pad), jnp.float32),
        grid_spec=grid_spec,
        compiler_params=compiler_params,
        cost_estimate=cost,
    )(x1f, x2f, w1, w2, b2)

    return out[:B, :C]


def _make_inputs(key, B, T, F, C):
    k1, k2, kw, kb = jax.random.split(key, 4)
    D = 2 * T * F
    x1 = jax.random.normal(k1, (B, T, F), dtype=jnp.float32)
    x2 = jax.random.normal(k2, (B, T, F), dtype=jnp.float32)
    bound = 1.0 / math.sqrt(D)   # nn.Linear-style U(-1/sqrt(D), 1/sqrt(D))
    weight = jax.random.uniform(kw, (C, D), minval=-bound, maxval=bound,
                                dtype=jnp.float32)
    bias = jax.random.uniform(kb, (C,), minval=-bound, maxval=bound,
                              dtype=jnp.float32)
    return x1, x2, weight, bias


def _reference(x1, x2, weight, bias):
    B = x1.shape[0]
    x = jnp.concatenate([x1, x2], axis=1).reshape(B, -1)
    return jax.nn.sigmoid(x @ weight.T + bias)


if __name__ == "__main__":
    key = jax.random.PRNGKey(0)
    k_small, k_large = jax.random.split(key)

    # Small shapes consistent with the module:
    #   batch=8, team_size=4, num_features=16 (D = 128), num_classes=8.
    x1, x2, w, b = _make_inputs(k_small, 8, 4, 16, 8)
    out = jax.block_until_ready(lr_forward(x1, x2, w, b))
    ref = _reference(x1, x2, w, b)
    assert out.shape == ref.shape
    err = float(jnp.max(jnp.abs(out - ref)))
    assert err < 2e-3, err

    # Larger shapes: B=256, K=512, C=256 -> exercises the (M, N) grid and the
    # megacore batch-tile split.
    x1, x2, w, b = _make_inputs(k_large, 256, 8, 64, 256)
    ref = _reference(x1, x2, w, b)

    out = jax.block_until_ready(lr_forward(x1, x2, w, b))
    err = float(jnp.max(jnp.abs(out - ref)))
    assert err < 2e-3, err

    # Force the split-K accumulator path (K grid axis + pl.when init/finalize).
    out_sk = jax.block_until_ready(
        lr_forward(x1, x2, w, b, tile_k=256, max_fullk=128))
    err = float(jnp.max(jnp.abs(out_sk - ref)))
    assert err < 2e-3, err

    # bf16-at-HBM operands, f32 MXU accumulation.
    out_bf16 = jax.block_until_ready(lr_forward(x1, x2, w, b, use_bf16_mxu=True))
    err = float(jnp.max(jnp.abs(out_bf16 - ref)))
    assert err < 2e-2, err

    print("KERNEL_OK")
</pallas_src>

<mosaic_0001>
module attributes {stable_mosaic.version = 11 : i64} {
  func.func @_lr_kernel_fullk(%arg0: i32, %arg1: i32, %arg2: memref<8x128xf32, #tpu.memory_space<vmem>>, %arg3: memref<8x128xf32, #tpu.memory_space<vmem>>, %arg4: memref<128x128xf32, #tpu.memory_space<vmem>>, %arg5: memref<128x128xf32, #tpu.memory_space<vmem>>, %arg6: memref<1x128xf32, #tpu.memory_space<vmem>>, %arg7: memref<8x128xf32, #tpu.memory_space<vmem>>) attributes {dimension_semantics = [#tpu.dimension_semantics<parallel>, #tpu.dimension_semantics<parallel>], iteration_bounds = array<i64: 1, 1>, scalar_prefetch = 0 : i64, scratch_operands = 0 : i64, tpu.core_type = #tpu.core_type<tc>, window_params = [{transform_indices = @transform_0, window_bounds = array<i64: 8, 128>}, {transform_indices = @transform_1, window_bounds = array<i64: 8, 128>}, {transform_indices = @transform_2, window_bounds = array<i64: 128, 128>}, {transform_indices = @transform_3, window_bounds = array<i64: 128, 128>}, {transform_indices = @transform_4, window_bounds = array<i64: 1, 128>}, {transform_indices = @transform_5, window_bounds = array<i64: 8, 128>}]} {
    %c0 = arith.constant 0 : index
    %c0_0 = arith.constant 0 : index
    %0 = vector.load %arg2[%c0, %c0_0] : memref<8x128xf32, #tpu.memory_space<vmem>>, vector<8x128xf32>
    %c0_1 = arith.constant 0 : index
    %c0_2 = arith.constant 0 : index
    %1 = vector.load %arg4[%c0_1, %c0_2] : memref<128x128xf32, #tpu.memory_space<vmem>>, vector<128x128xf32>
    %cst = arith.constant dense<0.000000e+00> : vector<8x128xf32>
    %2 = tpu.matmul %0, %1, %cst {dimension_numbers = #tpu.dot_dimension_numbers<[1], [1], [0], [0], [0, 0, 1, 0], [], []>} : vector<8x128xf32>, vector<128x128xf32>, vector<8x128xf32> -> vector<8x128xf32>
    %c0_3 = arith.constant 0 : index
    %c0_4 = arith.constant 0 : index
    %3 = vector.load %arg3[%c0_3, %c0_4] : memref<8x128xf32, #tpu.memory_space<vmem>>, vector<8x128xf32>
    %c0_5 = arith.constant 0 : index
    %c0_6 = arith.constant 0 : index
    %4 = vector.load %arg5[%c0_5, %c0_6] : memref<128x128xf32, #tpu.memory_space<vmem>>, vector<128x128xf32>
    %cst_7 = arith.constant dense<0.000000e+00> : vector<8x128xf32>
    %5 = tpu.matmul %3, %4, %cst_7 {dimension_numbers = #tpu.dot_dimension_numbers<[1], [1], [0], [0], [0, 0, 1, 0], [], []>} : vector<8x128xf32>, vector<128x128xf32>, vector<8x128xf32> -> vector<8x128xf32>
    %6 = arith.addf %2, %5 : vector<8x128xf32>
    %c0_8 = arith.constant 0 : index
    %c0_9 = arith.constant 0 : index
    %7 = vector.load %arg6[%c0_8, %c0_9] : memref<1x128xf32, #tpu.memory_space<vmem>>, vector<1x128xf32>
    %8 = vector.broadcast %7 : vector<1x128xf32> to vector<8x128xf32>
    %9 = arith.addf %6, %8 : vector<8x128xf32>
    %cst_10 = arith.constant 0.000000e+00 : f32
    %10 = vector.broadcast %cst_10 : f32 to vector<8x128xf32>
    %11 = arith.subf %10, %9 : vector<8x128xf32>
    %12 = math.exp %11 : vector<8x128xf32>
    %cst_11 = arith.constant 1.000000e+00 : f32
    %13 = vector.broadcast %cst_11 : f32 to vector<8x128xf32>
    %14 = arith.addf %13, %12 : vector<8x128xf32>
    %cst_12 = arith.constant 1.000000e+00 : f32
    %15 = vector.broadcast %cst_12 : f32 to vector<8x128xf32>
    %16 = arith.divf %15, %14 : vector<8x128xf32>
    %c0_13 = arith.constant 0 : index
    %c0_14 = arith.constant 0 : index
    %17 = vector.load %arg7[%c0_13, %c0_14] : memref<8x128xf32, #tpu.memory_space<vmem>>, vector<8x128xf32>
    tpu.vector_store %arg7[%c0_13, %c0_14], %16 {strides = array<i32>} : memref<8x128xf32, #tpu.memory_space<vmem>>, vector<8x128xf32>,
    return
  }
  func.func @transform_0(%arg0: i32, %arg1: i32) -> (i32, i32) {
    %c0_i32 = arith.constant 0 : i32
    %c0_i32_0 = arith.constant 0 : i32
    return %arg0, %c0_i32 : i32, i32
  }
  func.func @transform_1(%arg0: i32, %arg1: i32) -> (i32, i32) {
    %c0_i32 = arith.constant 0 : i32
    %c0_i32_0 = arith.constant 0 : i32
    return %arg0, %c0_i32 : i32, i32
  }
  func.func @transform_2(%arg0: i32, %arg1: i32) -> (i32, i32) {
    %c0_i32 = arith.constant 0 : i32
    %c0_i32_0 = arith.constant 0 : i32
    return %arg1, %c0_i32 : i32, i32
  }
  func.func @transform_3(%arg0: i32, %arg1: i32) -> (i32, i32) {
    %c0_i32 = arith.constant 0 : i32
    %c0_i32_0 = arith.constant 0 : i32
    return %arg1, %c0_i32 : i32, i32
  }
  func.func @transform_4(%arg0: i32, %arg1: i32) -> (i32, i32) {
    %c0_i32 = arith.constant 0 : i32
    %c0_i32_0 = arith.constant 0 : i32
    return %c0_i32, %arg1 : i32, i32
  }
  func.func @transform_5(%arg0: i32, %arg1: i32) -> (i32, i32) {
    %c0_i32 = arith.constant 0 : i32
    return %arg0, %arg1 : i32, i32
  }
}

</mosaic_0001>

<bundles_post_ra>
// kernel: lr_forward.1
= control target key start
LH: loop header
LB: loop body
LE: loop exit
PB: predicated region body
PF: predicated region fallthrough
CT: control target
= control target key end

     0   :  { %10 = vsyncpa [#allocation3], 0  ;;  %s732_s0 = inlined_call_operand.hbm [shape: f32[8,128], index: 0, kind: input, shape index: {}]   ;;  %s733_s1 = inlined_call_operand.hbm [shape: f32[8,128], index: 1, kind: input, shape index: {}]   ;;  %s734_s2 = inlined_call_operand.hbm [shape: f32[128,128], index: 2, kind: input, shape index: {}]   ;;  %s735_s3 = inlined_call_operand.hbm [shape: f32[128,128], index: 3, kind: input, shape index: {}]   ;;  %s736_s4 = inlined_call_operand.hbm [shape: f32[1,128], index: 4, kind: input, shape index: {}]   ;;  %s737_s5 = inlined_call_operand.hbm [shape: f32[8,128], index: 5, kind: output, shape index: {}]  }
   0x1   :  { %11 = vsyncpa [#allocation6], 0 }
   0x2   :  { %12 = vsyncpa [#allocation9], 0 }
   0x3   :  { %13 = vsyncpa [#allocation4], 0  ;;  %s597_s18 = smov [#allocation5]   ;;  %s457_s22 = scalar_lea.hbm %s733_s1, 128 }
   0x4   :  { %s30_s19 = sshll.u32 %s597_s18, 4  ;;  %p458_p0 = scmp.ne.s32.totalorder %s733_s1, %s457_s22  ;;  %s31_s19 = int_to_ptr.vmem [resolvable:$true] %s30_s19 }
   0x5   :  { %p461_p1 = scmp.lt.u32.totalorder %s457_s22, %s733_s1 }
   0x7   :  { %p463_p2 = pnand %p461_p1, %p458_p0 }
   0x9   :  { %466 = shalt.err (!%p463_p2)
}
   0xa   :  { %s467_s27 = scalar_lea.vmem %s31_s19, 128  ;;  %p472_p4 = scmp.lt.s32.totalorder %s31_s19, %s31_s19 }
   0xb   :  { %p468_p3 = scmp.ne.s32.totalorder %s31_s19, %s467_s27  ;;  %p473_p5 = scmp.lt.s32.totalorder %s467_s27, %s467_s27 }
   0xd   :  { %p474_p6 = por %p473_p5, %p472_p4 }
   0xf   :  { %p475_p7 = pnand %p474_p6, %p468_p3 }
  0x11   :  { %478 = shalt.err (!%p475_p7)
}
  0x12   :  { %33 = dma.hbm_to_vmem [thread:$0]  %s733_s1, 128, %s31_s19, [#allocation6]  }
  0x13   :  { %s598_s30 = smov [#allocation8]   ;;  %s599_s7 = smov [#allocation2]  }
  0x14   :  { %s51_s6 = sshll.u32 %s598_s30, 4  ;;  %s20_s8 = sshll.u32 %s599_s7, 4  ;;  %s52_s6 = int_to_ptr.vmem [resolvable:$true] %s51_s6  ;;  %s21_s8 = int_to_ptr.vmem [resolvable:$true] %s20_s8 }
  0x15   :  { %s479_s11 = scalar_lea.hbm %s735_s3, 2048 }
  0x16   :  { %p480_p8 = scmp.ne.s32.totalorder %s735_s3, %s479_s11  ;;  %p483_p9 = scmp.lt.u32.totalorder %s479_s11, %s735_s3 }
  0x18   :  { %p485_p10 = pnand %p483_p9, %p480_p8 }
  0x1a   :  { %488 = shalt.err (!%p485_p10)
}
  0x1b   :  { %s489_s1 = scalar_lea.vmem %s52_s6, 2048  ;;  %p494_p12 = scmp.lt.s32.totalorder %s52_s6, %s52_s6 }
  0x1c   :  { %p490_p11 = scmp.ne.s32.totalorder %s52_s6, %s489_s1  ;;  %p495_p13 = scmp.lt.s32.totalorder %s489_s1, %s489_s1 }
  0x1e   :  { %p496_p0 = por %p495_p13, %p494_p12 }
  0x20   :  { %p497_p1 = pnand %p496_p0, %p490_p11 }
  0x22   :  { %500 = shalt.err (!%p497_p1)
}
  0x23   :  { %s600_s16 = smov 128   ;;  %s601_s17 = smov 8  }
  0x24   :  { %57 = dma.hbm_to_vmem [thread:$0]  %s735_s3, 2048, %s52_s6, [#allocation9], %s600_s16, %s600_s16, %s601_s17  }
  0x25   :  { %s501_s22 = scalar_lea.hbm %s732_s0, 128 }
  0x26   :  { %p502_p2 = scmp.ne.s32.totalorder %s732_s0, %s501_s22  ;;  %p505_p3 = scmp.lt.u32.totalorder %s501_s22, %s732_s0 }
  0x28   :  { %p507_p4 = pnand %p505_p3, %p502_p2 }
  0x2a   :  { %510 = shalt.err (!%p507_p4)
}
  0x2b   :  { %s511_s27 = scalar_lea.vmem %s21_s8, 128  ;;  %p516_p6 = scmp.lt.s32.totalorder %s21_s8, %s21_s8 }
  0x2c   :  { %p512_p5 = scmp.ne.s32.totalorder %s21_s8, %s511_s27  ;;  %p517_p7 = scmp.lt.s32.totalorder %s511_s27, %s511_s27 }
  0x2e   :  { %p518_p8 = por %p517_p7, %p516_p6 }
  0x30   :  { %p519_p9 = pnand %p518_p8, %p512_p5 }
  0x32   :  { %522 = shalt.err (!%p519_p9)
}
  0x33   :  { %23 = dma.hbm_to_vmem [thread:$0]  %s732_s0, 128, %s21_s8, [#allocation3]  }
  0x34   :  { %s602_s29 = smov [#allocation7]   ;;  %s603_s6 = smov [#allocation10]  }
  0x35   :  { %s39_s30 = sshll.u32 %s602_s29, 4  ;;  %s64_s7 = sshll.u32 %s603_s6, 4  ;;  %s40_s30 = int_to_ptr.vmem [resolvable:$true] %s39_s30  ;;  %s65_s7 = int_to_ptr.vmem [resolvable:$true] %s64_s7 }
  0x36   :  { %s523_s11 = scalar_lea.hbm %s734_s2, 2048 }
  0x37   :  { %p524_p10 = scmp.ne.s32.totalorder %s734_s2, %s523_s11  ;;  %p527_p11 = scmp.lt.u32.totalorder %s523_s11, %s734_s2 }
  0x39   :  { %p529_p12 = pnand %p527_p11, %p524_p10 }
  0x3b   :  { %532 = shalt.err (!%p529_p12)
}
  0x3c   :  { %s533_s0 = scalar_lea.vmem %s40_s30, 2048  ;;  %p538_p0 = scmp.lt.s32.totalorder %s40_s30, %s40_s30 }
  0x3d   :  { %p534_p13 = scmp.ne.s32.totalorder %s40_s30, %s533_s0  ;;  %p539_p1 = scmp.lt.s32.totalorder %s533_s0, %s533_s0 }
  0x3f   :  { %p540_p2 = por %p539_p1, %p538_p0 }
  0x41   :  { %p541_p3 = pnand %p540_p2, %p534_p13 }
  0x43   :  { %544 = shalt.err (!%p541_p3)
}
  0x44   :  { %45 = dma.hbm_to_vmem [thread:$0]  %s734_s2, 2048, %s40_s30, [#allocation6], %s600_s16, %s600_s16, %s601_s17  }
  0x45   :  { %s545_s20 = scalar_lea.hbm %s736_s4, 16 }
  0x46   :  { %p546_p4 = scmp.ne.s32.totalorder %s736_s4, %s545_s20  ;;  %p549_p5 = scmp.lt.u32.totalorder %s545_s20, %s736_s4 }
  0x48   :  { %p551_p6 = pnand %p549_p5, %p546_p4 }
  0x4a   :  { %554 = shalt.err (!%p551_p6)
}
  0x4b   :  { %s555_s25 = scalar_lea.vmem %s65_s7, 16  ;;  %s559_s26 = scalar_lea.vmem %s65_s7, 32 }
  0x4c   :  { %p556_p7 = scmp.ne.s32.totalorder %s65_s7, %s555_s25  ;;  %p560_p8 = scmp.lt.s32.totalorder %s65_s7, %s65_s7 }
  0x4d   :  { %p561_p9 = scmp.lt.s32.totalorder %s559_s26, %s555_s25 }
  0x4f   :  { %p562_p10 = por %p561_p9, %p560_p8 }
  0x51   :  { %p563_p11 = pnand %p562_p10, %p556_p7 }
  0x53   :  { %566 = shalt.err (!%p563_p11)
}
  0x54   :  { %67 = dma.hbm_to_vmem [thread:$0]  %s736_s4, 16, %s65_s7, [#allocation9]  }
  0x55   :  { %589 = dma.done.wait [#allocation3], 128  }
  0x56   :  { %590 = vsyncadd [#allocation3], 4294967168 }
  0x57   :  { %591 = dma.done.wait [#allocation6], 2176  }
  0x58   :  { %592 = vsyncadd [#allocation6], 4294965120 }
  0x59   :  { %593 = dma.done.wait [#allocation9], 2064  }
  0x5a   :  { %594 = vsyncadd [#allocation9], 4294965232  ;;  %v604_v0 = vmov 0.0|0.0   ;;  %vm605_vm0 = vmmov 0   ;;  %v606_v1 = vmov 0.0   ;;  %v101_v2 = vld [vmem:[#allocation8] sm:$0xff] }
  0x5b   :  { %394 = vmatprep.subr.bf16.mxu0 %v604_v0  ;;  %418 = vmatprep.subr.bf16.mxu1 %v604_v0  ;;  %v102_v3 = vld [vmem:[#allocation8 + $0x8] sm:$0xff]  ;;  %v84_v4 = vld [vmem:[#allocation7] sm:$0xff]  ;;  %v103_v8 = vld [vmem:[#allocation8 + $0x10] sm:$0xff]  ;;  %s607_s4 = smov [#allocation11]  }
  0x5c   :  { %356 = vmatprep.mubr.msk.f32.mxu0 %vm605_vm0, %v606_v1  ;;  %391 = vmatprep.mubr.msk.f32.mxu1 %vm605_vm0, %v606_v1  ;;  %v395_v5 = vpack.c.bf16 %v102_v3, %v101_v2  ;;  %v85_v6 = vld [vmem:[#allocation7 + $0x8] sm:$0xff]  ;;  %v104_v9 = vld [vmem:[#allocation8 + $0x18] sm:$0xff]  ;;  %v86_v10 = vld [vmem:[#allocation7 + $0x10] sm:$0xff]  ;;  %s278_s17 = sshll.u32 %s607_s4, 4  ;;  %s279_s17 = int_to_ptr.vmem [resolvable:$true] %s278_s17 }
  0x5d   :  { %v419_v7 = vpack.c.bf16 %v85_v6, %v84_v4  ;;  %v87_v11 = vld [vmem:[#allocation7 + $0x18] sm:$0xff]  ;;  %v398_v12 = vpack.c.bf16 %v104_v9, %v103_v8  ;;  %v105_v14 = vld [vmem:[#allocation8 + $0x20] sm:$0xff]  ;;  %v106_v15 = vld [vmem:[#allocation8 + $0x28] sm:$0xff]  ;;  %s567_s27 = scalar_lea.vmem %s279_s17, 128  ;;  %p572_p13 = scmp.lt.s32.totalorder %s279_s17, %s279_s17 }
  0x5e   :  { %396 = vmatpush3.bf16.xpose.msra.mxu0 %v395_v5  ;;  %v422_v13 = vpack.c.bf16 %v87_v11, %v86_v10  ;;  %v88_v16 = vld [vmem:[#allocation7 + $0x20] sm:$0xff]  ;;  %v89_v17 = vld [vmem:[#allocation7 + $0x28] sm:$0xff]  ;;  %v401_v18 = vpack.c.bf16 %v106_v15, %v105_v14  ;;  %v107_v20 = vld [vmem:[#allocation8 + $0x30] sm:$0xff]  ;;  %p568_p12 = scmp.ne.s32.totalorder %s279_s17, %s567_s27  ;;  %p573_p0 = scmp.lt.s32.totalorder %s567_s27, %s567_s27 }
  0x5f   :  { %420 = vmatpush3.bf16.xpose.msra.mxu1 %v419_v7  ;;  %397 = vmatprep.subr.bf16.mxu0 %v604_v0  ;;  %v425_v19 = vpack.c.bf16 %v89_v17, %v88_v16  ;;  %v108_v21 = vld [vmem:[#allocation8 + $0x38] sm:$0xff]  ;;  %v90_v22 = vld [vmem:[#allocation7 + $0x30] sm:$0xff]  ;;  %v109_v26 = vld [vmem:[#allocation8 + $0x40] sm:$0xff] }
  0x60   :  { %421 = vmatprep.subr.bf16.mxu1 %v604_v0  ;;  %v91_v23 = vld [vmem:[#allocation7 + $0x38] sm:$0xff]  ;;  %v404_v24 = vpack.c.bf16 %v108_v21, %v107_v20  ;;  %v110_v27 = vld [vmem:[#allocation8 + $0x48] sm:$0xff]  ;;  %v92_v28 = vld [vmem:[#allocation7 + $0x40] sm:$0xff]  ;;  %p574_p1 = por %p573_p0, %p572_p13 }
  0x61   :  { %v428_v25 = vpack.c.bf16 %v91_v23, %v90_v22  ;;  %v93_v29 = vld [vmem:[#allocation7 + $0x48] sm:$0xff]  ;;  %v407_v30 = vpack.c.bf16 %v110_v27, %v109_v26  ;;  %v111_v32 = vld [vmem:[#allocation8 + $0x50] sm:$0xff]  ;;  %v112_v33 = vld [vmem:[#allocation8 + $0x58] sm:$0xff] }
  0x62   :  { %v431_v31 = vpack.c.bf16 %v93_v29, %v92_v28  ;;  %v94_v34 = vld [vmem:[#allocation7 + $0x50] sm:$0xff]  ;;  %v95_v35 = vld [vmem:[#allocation7 + $0x58] sm:$0xff]  ;;  %v410_v36 = vpack.c.bf16 %v112_v33, %v111_v32  ;;  %v113_v38 = vld [vmem:[#allocation8 + $0x60] sm:$0xff]  ;;  %p575_p2 = pnand %p574_p1, %p568_p12 }
  0x63   :  { %v434_v37 = vpack.c.bf16 %v95_v35, %v94_v34  ;;  %v114_v39 = vld [vmem:[#allocation8 + $0x68] sm:$0xff]  ;;  %v96_v40 = vld [vmem:[#allocation7 + $0x60] sm:$0xff]  ;;  %v115_v44 = vld [vmem:[#allocation8 + $0x70] sm:$0xff] }
  0x64   :  { %v97_v41 = vld [vmem:[#allocation7 + $0x68] sm:$0xff]  ;;  %v413_v42 = vpack.c.bf16 %v114_v39, %v113_v38  ;;  %v116_v45 = vld [vmem:[#allocation8 + $0x78] sm:$0xff]  ;;  %v98_v46 = vld [vmem:[#allocation7 + $0x70] sm:$0xff] }
  0x65   :  { %v437_v43 = vpack.c.bf16 %v97_v41, %v96_v40  ;;  %v99_v47 = vld [vmem:[#allocation7 + $0x78] sm:$0xff]  ;;  %v416_v48 = vpack.c.bf16 %v116_v45, %v115_v44  ;;  %v83_v51 = vld [vmem:[#allocation2] sm:$0xff]  ;;  %v289_v54 = vld [vmem:[#allocation10] ss:$0 sm:$0xff] }
  0x66   :  { %399 = vmatpush3.bf16.xpose.msra.mxu0 %v398_v12  ;;  %v440_v49 = vpack.c.bf16 %v99_v47, %v98_v46  ;;  %v100_v50 = vld [vmem:[#allocation5] sm:$0xff] }
  0x67   :  { %423 = vmatpush3.bf16.xpose.msra.mxu1 %v422_v13  ;;  %400 = vmatprep.subr.bf16.mxu0 %v604_v0 }
  0x68   :  { %424 = vmatprep.subr.bf16.mxu1 %v604_v0 }
  0x6e   :  { %402 = vmatpush3.bf16.xpose.msra.mxu0 %v401_v18 }
  0x6f   :  { %426 = vmatpush3.bf16.xpose.msra.mxu1 %v425_v19  ;;  %403 = vmatprep.subr.bf16.mxu0 %v604_v0 }
  0x70   :  { %427 = vmatprep.subr.bf16.mxu1 %v604_v0 }
  0x76   :  { %405 = vmatpush3.bf16.xpose.msra.mxu0 %v404_v24 }
  0x77   :  { %429 = vmatpush3.bf16.xpose.msra.mxu1 %v428_v25  ;;  %406 = vmatprep.subr.bf16.mxu0 %v604_v0 }
  0x78   :  { %430 = vmatprep.subr.bf16.mxu1 %v604_v0 }
  0x7e   :  { %408 = vmatpush3.bf16.xpose.msra.mxu0 %v407_v30 }
  0x7f   :  { %432 = vmatpush3.bf16.xpose.msra.mxu1 %v431_v31  ;;  %409 = vmatprep.subr.bf16.mxu0 %v604_v0 }
  0x80   :  { %433 = vmatprep.subr.bf16.mxu1 %v604_v0 }
  0x86   :  { %411 = vmatpush3.bf16.xpose.msra.mxu0 %v410_v36 }
  0x87   :  { %435 = vmatpush3.bf16.xpose.msra.mxu1 %v434_v37  ;;  %412 = vmatprep.subr.bf16.mxu0 %v604_v0 }
  0x88   :  { %436 = vmatprep.subr.bf16.mxu1 %v604_v0 }
  0x8e   :  { %414 = vmatpush3.bf16.xpose.msra.mxu0 %v413_v42 }
  0x8f   :  { %438 = vmatpush3.bf16.xpose.msra.mxu1 %v437_v43  ;;  %415 = vmatprep.subr.bf16.mxu0 %v604_v0 }
  0x90   :  { %439 = vmatprep.subr.bf16.mxu1 %v604_v0 }
  0x96   :  { %417 = vmatpush3.bf16.xpose.msra.mxu0 %v416_v48 }
  0x97   :  { %441 = vmatpush3.bf16.xpose.msra.mxu1 %v440_v49 }
  0x9d   :  { %357 = vmatmul.mubr.f32.vlgmr.msra.gmra.mrb[0].mxu0 %v100_v50 }
  0x9e   :  { %392 = vmatmul.mubr.f32.vlgmr.msra.gmra.mrb[0].mxu1 %v83_v51 }
 0x170   :  { %v183_v52 = vpop.f32.mrb[0].mxu0 }
 0x171   :  { %v253_v53 = vpop.f32.mrb[0].mxu1  ;;  %v358_v55 = vpop.f32.mrb[1].mxu0 }
 0x172   :  { %v254_v56 = vadd.f32 %v253_v53, %v183_v52  ;;  %v393_v57 = vpop.f32.mrb[1].mxu1 }
 0x174   :  { %v264_v58 = vadd.f32 %v289_v54, %v254_v56 }
 0x176   :  { %v265_v59 = vsub.f32 0.0, %v264_v58 }
 0x178   :  { %v266_v60 = vmul.f32 1.442695, %v265_v59 }
 0x17a   :  { %453 = vpow2.f32 %v266_v60 }
 0x184   :  { %v454_v61 = vpop.eup %453 }
 0x185   :  { %v268_v62 = vadd.f32 1.0, %v454_v61 }
 0x187   :  { %455 = vrcp.f32 %v268_v62 }
 0x191   :  { %v456_v63 = vpop.eup %455 }
 0x192   :  { %271 = vst [vmem:[#allocation11] sm:$0xff] %v456_v63 }
 0x193   :  { %578 = shalt.err (!%p575_p2)
}
 0x194   :  { %s579_s29 = scalar_lea.hbm %s737_s5, 128 }
 0x195   :  { %p580_p3 = scmp.ne.s32.totalorder %s737_s5, %s579_s29  ;;  %p583_p4 = scmp.lt.u32.totalorder %s579_s29, %s737_s5 }
 0x197   :  { %p585_p5 = pnand %p583_p4, %p580_p3 }
 0x199   :  { %588 = shalt.err (!%p585_p5)
}
 0x19a   :  { %281 = dma.vmem_to_hbm [thread:$0]  %s279_s17, 128, %s737_s5, [#allocation4]  }
 0x19b   :  { %595 = dma.done.wait [#allocation4], 128  }
 0x19c   :  { %596 = vsyncadd [#allocation4], 4294967168 }
 0x19d   :  { %285 = vsyncpa [#allocation3], 1 }
 0x19e   :  { %286 = vsyncpa [#allocation6], 1 }
 0x19f   :  { %287 = vsyncpa [#allocation9], 1 }
 0x1a0   :  { %288 = vsyncpa [#allocation4], 1 }

</bundles_post_ra>
